<compile_context>
chip_gen: v7x
topology: tpu7x:2x2x1
jax: 0.10.0
libtpu: 0.0.40
codegen_flags: <defaults>
</compile_context>

<pallas_src>
import math

import jax
import jax.numpy as jnp
from jax import lax
from jax.experimental import pallas as pl
from jax.experimental.pallas import tpu as pltpu

_EPS = 1e-8


# ----------------------------------------------------------------------------
# Kernels
# ----------------------------------------------------------------------------


def _pixelnorm_chan_kernel(x_ref, o_ref):
    # x_ref / o_ref: (1, C, Mt).  Normalize over the channel axis (axis 0 of
    # the squeezed (C, Mt) tile).  Last dim Mt is lane-dense.
    x = x_ref[0].astype(jnp.float32)                    # (C, Mt)
    ms = jnp.mean(x * x, axis=0, keepdims=True)         # (1, Mt)  one-pass stats
    o_ref[0] = (x * lax.rsqrt(ms + _EPS)).astype(o_ref.dtype)


def _pixelnorm_rows_kernel(x_ref, o_ref):
    # x_ref / o_ref: (Nt, D).  Normalize each row over the last (lane) axis.
    x = x_ref[...].astype(jnp.float32)                  # (Nt, D)
    ms = jnp.mean(x * x, axis=-1, keepdims=True)        # (Nt, 1)
    o_ref[...] = (x * lax.rsqrt(ms + _EPS)).astype(o_ref.dtype)


# ----------------------------------------------------------------------------
# Wrappers
# ----------------------------------------------------------------------------


def _pick_lane_tile(M, C, itemsize, budget_bytes=2 * 1024 * 1024):
    """Largest power-of-two multiple of 128 dividing M within the VMEM budget.
    Falls back to the full dimension (single tile) when M is not 128-aligned."""
    if M % 128 != 0:
        return M
    best = None
    t = 128
    while t <= M:
        if M % t == 0 and C * t * itemsize <= budget_bytes:
            best = t
        t *= 2
    return best if best is not None else M


def _pixel_norm_3d(x):
    """x: (N, C, M); normalize over C. Block = (1, C, Mt), lane axis = M."""
    N, C, M = x.shape
    Mt = _pick_lane_tile(M, C, x.dtype.itemsize)
    grid = (N, M // Mt)
    return pl.pallas_call(
        _pixelnorm_chan_kernel,
        out_shape=jax.ShapeDtypeStruct(x.shape, x.dtype),
        grid=grid,
        in_specs=[pl.BlockSpec((1, C, Mt), lambda n, m: (n, 0, m))],
        out_specs=pl.BlockSpec((1, C, Mt), lambda n, m: (n, 0, m)),
        compiler_params=pltpu.CompilerParams(
            dimension_semantics=("parallel", "parallel")),
    )(x)


def _pixel_norm_2d(x):
    """x: (N, D); normalize each row over D (the lane axis)."""
    N, D = x.shape
    Nt = N
    for t in (512, 256, 128, 64, 32, 16, 8):   # largest sublane-aligned divisor
        if N % t == 0:
            Nt = t
            break
    grid = (N // Nt,)
    return pl.pallas_call(
        _pixelnorm_rows_kernel,
        out_shape=jax.ShapeDtypeStruct(x.shape, x.dtype),
        grid=grid,
        in_specs=[pl.BlockSpec((Nt, D), lambda i: (i, 0))],
        out_specs=pl.BlockSpec((Nt, D), lambda i: (i, 0)),
        compiler_params=pltpu.CompilerParams(
            dimension_semantics=("parallel",)),
    )(x)


def pixel_norm(x):
    """PixelNorm: x / sqrt(mean(x**2, dim=1, keepdim=True) + 1e-8).

    Supports the two shapes StyleGAN1 uses it on:
      * (N, D)            latent / style codes (mapping MLP)
      * (N, C, H, W, ...) feature maps (any trailing spatial dims)
    """
    if x.ndim < 2:
        raise ValueError("PixelNorm needs a dim-1 axis to normalize over")
    if x.ndim == 2:
        return _pixel_norm_2d(x)
    N, C = x.shape[0], x.shape[1]
    M = int(math.prod(x.shape[2:]))
    out = _pixel_norm_3d(x.reshape(N, C, M))
    return out.reshape(x.shape)


# ----------------------------------------------------------------------------
# main
# ----------------------------------------------------------------------------

if __name__ == "__main__":
    key = jax.random.PRNGKey(0)
    k1, k2 = jax.random.split(key)

    # 4-D feature-map case (NCHW), small shapes: batch=2, channels=4, 16x16.
    x4 = jax.random.normal(k1, (2, 4, 16, 16), jnp.float32)
    y4 = jax.block_until_ready(pixel_norm(x4))
    ref4 = x4 / jnp.sqrt(jnp.mean(x4 ** 2, axis=1, keepdims=True) + _EPS)
    assert y4.shape == x4.shape
    assert bool(jnp.all(jnp.isfinite(y4)))
    err4 = float(jnp.max(jnp.abs(y4 - ref4)))
    assert err4 < 1e-5, err4

    # 2-D latent-code case (N, style_dim), as used in the StyleGAN mapping MLP.
    x2 = jax.random.normal(k2, (2, 32), jnp.float32)
    y2 = jax.block_until_ready(pixel_norm(x2))
    ref2 = x2 / jnp.sqrt(jnp.mean(x2 ** 2, axis=1, keepdims=True) + _EPS)
    err2 = float(jnp.max(jnp.abs(y2 - ref2)))
    assert err2 < 1e-5, err2

    print("KERNEL_OK")
</pallas_src>

<mosaic_0001>
module attributes {stable_mosaic.version = 11 : i64} {
  func.func @_pixelnorm_chan_kernel(%arg0: i32, %arg1: i32, %arg2: memref<1x4x256xf32, #tpu.memory_space<vmem>>, %arg3: memref<1x4x256xf32, #tpu.memory_space<vmem>>) attributes {dimension_semantics = [#tpu.dimension_semantics<parallel>, #tpu.dimension_semantics<parallel>], iteration_bounds = array<i64: 2, 1>, scalar_prefetch = 0 : i64, scratch_operands = 0 : i64, tpu.core_type = #tpu.core_type<tc>, window_params = [{transform_indices = @transform_0, window_bounds = array<i64: 1, 4, 256>}, {transform_indices = @transform_1, window_bounds = array<i64: 1, 4, 256>}]} {
    %c0 = arith.constant 0 : index
    %c0_0 = arith.constant 0 : index
    %c0_1 = arith.constant 0 : index
    %0 = vector.load %arg2[%c0, %c0_0, %c0_1] : memref<1x4x256xf32, #tpu.memory_space<vmem>>, vector<1x4x256xf32>
    %1 = vector.shape_cast %0 : vector<1x4x256xf32> to vector<4x256xf32>
    %2 = arith.mulf %1, %1 : vector<4x256xf32>
    %cst = arith.constant dense<0.000000e+00> : vector<256xf32>
    %3 = vector.multi_reduction <add>, %2, %cst [0] : vector<4x256xf32> to vector<256xf32>
    %4 = vector.shape_cast %3 : vector<256xf32> to vector<1x256xf32>
    %cst_2 = arith.constant 4.000000e+00 : f32
    %5 = vector.broadcast %cst_2 : f32 to vector<1x256xf32>
    %6 = arith.divf %4, %5 : vector<1x256xf32>
    %cst_3 = arith.constant 9.99999993E-9 : f32
    %7 = vector.broadcast %cst_3 : f32 to vector<1x256xf32>
    %8 = arith.addf %6, %7 : vector<1x256xf32>
    %9 = math.rsqrt %8 : vector<1x256xf32>
    %10 = vector.broadcast %9 : vector<1x256xf32> to vector<4x256xf32>
    %11 = arith.mulf %1, %10 : vector<4x256xf32>
    %c0_4 = arith.constant 0 : index
    %c0_5 = arith.constant 0 : index
    %c0_6 = arith.constant 0 : index
    %12 = vector.load %arg3[%c0_4, %c0_5, %c0_6] : memref<1x4x256xf32, #tpu.memory_space<vmem>>, vector<1x4x256xf32>
    %13 = vector.shape_cast %12 : vector<1x4x256xf32> to vector<4x256xf32>
    %14 = vector.shape_cast %11 : vector<4x256xf32> to vector<1x4x256xf32>
    tpu.vector_store %arg3[%c0_4, %c0_5, %c0_6], %14 {strides = array<i32>} : memref<1x4x256xf32, #tpu.memory_space<vmem>>, vector<1x4x256xf32>,
    return
  }
  func.func @transform_0(%arg0: i32, %arg1: i32) -> (i32, i32, i32) {
    %c0_i32 = arith.constant 0 : i32
    %c0_i32_0 = arith.constant 0 : i32
    return %arg0, %c0_i32, %arg1 : i32, i32, i32
  }
  func.func @transform_1(%arg0: i32, %arg1: i32) -> (i32, i32, i32) {
    %c0_i32 = arith.constant 0 : i32
    %c0_i32_0 = arith.constant 0 : i32
    return %arg0, %c0_i32, %arg1 : i32, i32, i32
  }
}

</mosaic_0001>

<bundles_post_ra>
// kernel: tpu_custom_call.1
= control target key start
LH: loop header
LB: loop body
LE: loop exit
PB: predicated region body
PF: predicated region fallthrough
CT: control target
= control target key end

     0   :  { %6 = vsyncpa [#allocation3], 0  ;;  %s672_s0 = inlined_call_operand.hbm [shape: f32[2,4,256], index: 0, kind: input, shape index: {}]   ;;  %s673_s1 = inlined_call_operand.hbm [shape: f32[2,4,256], index: 1, kind: output, shape index: {}]  }
   0x1   :  { %8 = vsyncpa [#allocation3 + $0x1], 0 }
   0x2   :  { %9 = vsyncpa [#allocation4], 0 }
   0x3   :  { %11 = vsyncpa [#allocation4 + $0x1], 0  ;;  %s496_s6 = smov 0   ;;  %s498_s7 = smov 0  }
   0x4   :  { %s500_s8 = smov 0   ;;  %s502_s9 = smov 0  }
   0x5   :  { %s504_s10 = smov 0   ;;  %s506_s11 = smov 0  }
   0x6 LB: > { %s287_s12 = sadd.s32 4294967295, %s482_s11   ;;  %s288_s13 = sadd.s32 4294967294, %s482_s11   ;;  %s482_s11 = sphi %s506_s11, %s17_s11   ;;  %s478_s10 = sphi %s504_s10, %s689_s10   ;;  %s474_s9 = sphi %s502_s9, %s688_s9   ;;  %s470_s8 = sphi %s500_s8, %s687_s8   ;;  %s466_s7 = sphi %s498_s7, %s686_s7   ;;  %s462_s6 = sphi %s496_s6, %s685_s6  }
   0x7   : > { %s29_s14 = sadd.s32 1, %s478_s10  ;;  %s38_s15 = sadd.s32 1, %s470_s8 }
   0x8   : > { %p31_p0 = scmp.ge.s32.totalorder %s29_s14, 2  ;;  %p45_p1 = scmp.ne.s32.totalorder %s470_s8, %s466_s7 }
   0x9   : > { %p46_p2 = scmp.eq.s32.totalorder %s482_s11, 0  ;;  %p51_p3 = scmp.ne.s32.totalorder %s466_s7, %s462_s6 }
   0xa   : > { %s691_s14 = smov (%p31_p0, %s29_s14), 0  ;;  %p52_p5 = scmp.eq.s32.totalorder %s287_s12, 0 }
   0xb   : > { %p537_p4 = por %p46_p2, %p45_p1  ;;  %s33_s17 = ssub.s32 %s478_s10, %s691_s14 }
   0xc   : > { %p77_p6 = scmp.eq.s32.totalorder %s287_s12, 1  ;;  %p36_p7 = scmp.eq.s32.totalorder %s33_s17, 0 }
   0xd   : > { %p543_p8 = por %p52_p5, %p51_p3  ;;  %p83_p10 = scmp.eq.s32.totalorder %s288_s13, 1 }
   0xe   : > { %p547_p9 = por %p77_p6, %p45_p1  ;;  %p316_p13 = scmp.lt.s32.totalorder %s482_s11, 2 }
   0xf   : > { %s552_s20 = scalar_select %p36_p7, %s470_s8, %s38_s15  }
  0x10   : > { %s677_s19 = scalar_select %p547_p9, 1, 0 }
  0x11   : > { %p554_p11 = por %p83_p10, %p51_p3  ;;  %s103_s22 = sand.u32 1, %s470_s8  }
  0x12   : > { %s291_s23 = sshll.u32 %s103_s22, 3  ;;  %s302_s24 = sshll.u32 %s478_s10, 7 }
  0x13   : > { %s678_s21 = scalar_select %p554_p11, 1, 0 }
  0x14   : > { %s565_s27 = scalar_lea.hbm %s672_s0, %s302_s24  ;;  %s107_s28 = scalar_lea.vmem [#allocation2], %s291_s23 }
  0x15   : > { %s117_s29 = sshll.u32 %s107_s28, 4  ;;  %p571_p0 = pnand %p316_p13, %p537_p4  ;;  %s567_s29 = int_to_ptr.vmem [resolvable:$true] %s117_s29 }
  0x16   : > { %s104_s2 = scalar_lea.sflag [#allocation3], %s103_s22  ;;  %s370_s3 = scalar_lea.hbm %s565_s27, 128 }
  0x17   : > { %p371_p3 = scmp.ne.s32.totalorder %s565_s27, %s370_s3  ;;  %p372_p5 = pneg %p571_p0 }
  0x18   : > { %s375_s12 = scalar_lea.hbm %s672_s0, 256  ;;  %p376_p4 = scmp.lt.u32.totalorder %s565_s27, %s672_s0 }
  0x19   : > { %p373_p6 = pnand %p372_p5, %p371_p3  ;;  %p377_p10 = scmp.lt.u32.totalorder %s375_s12, %s370_s3 }
  0x1a   : > { %p379_p12 = scmp.lt.u32.totalorder %s370_s3, %s565_s27 }
  0x1b   : > { %p374_p7 = pneg %p373_p6  ;;  %p378_p13 = por %p377_p10, %p376_p4 }
  0x1d   : > { %p380_p1 = por %p379_p12, %p378_p13 }
  0x1f   : > { %p381_p2 = pnand %p380_p1, %p374_p7 }
  0x21   : > { %384 = shalt.err (!%p381_p2)
}
  0x22   : > { %s385_s16 = scalar_lea.vmem %s567_s29, 128  ;;  %s484_s17 = smov [#allocation2]  }
  0x23   : > { %p386_p3 = scmp.ne.s32.totalorder %s567_s29, %s385_s16  ;;  %s390_s22 = sshll.u32 %s484_s17, 4  ;;  %s391_s22 = int_to_ptr.vmem [resolvable:$false] %s390_s22 }
  0x24   : > { %s392_s23 = scalar_lea.vmem %s391_s22, 256  ;;  %p393_p9 = scmp.lt.s32.totalorder %s567_s29, %s391_s22 }
  0x25   : > { %p388_p6 = pnand %p386_p3, %p372_p5  ;;  %p394_p4 = scmp.lt.s32.totalorder %s392_s23, %s385_s16 }
  0x27   : > { %p389_p11 = pneg %p388_p6  ;;  %p395_p10 = por %p394_p4, %p393_p9 }
  0x29   : > { %p396_p12 = pnand %p395_p10, %p389_p11 }
  0x2b   : > { %399 = shalt.err (!%p396_p12)
}
  0x2c   : > { %311 = dma.hbm_to_vmem [thread:$0]  (!%p571_p0), %s565_s27, 128, %s567_s29, %s104_s2  }
  0x2d   : > { %p680_p1 = scmp.lt.s32.totalorder %s482_s11, 3  ;;  %p681_p2 = scmp.ge.s32.totalorder %s482_s11, 1 }
  0x2f   : > { %p123_p5 = pnand %p681_p2, %p680_p1 }
  0x30   : > { %s607_s24 = sand.u32 (!%p123_p5), 1, %s466_s7  }
  0x31   : > { %126 = sbr.rel (%p123_p5) target bundleno = 108 (0x6c), region = 24  ;;  %s295_s25 = sshll.u32 (!%p123_p5), %s607_s24, 3 }
  0x32   : > { %s129_s26 = scalar_lea.sflag (!%p123_p5), [#allocation3], %s607_s24  ;;  %s132_s28 = scalar_lea.vmem (!%p123_p5), [#allocation2], %s295_s25 }
  0x38   : > { %453 = dma.done.wait (%p543_p8), %s129_s26, 128  }
  0x39   : > { %455 = vsyncadd (%p543_p8), %s129_s26, 4294967168  ;;  %v153_v0 = vld [vmem:[%s132_s28] sm:$0xff]  ;;  %vm158_vm0 = vcmask 1043456   ;;  %s150_s18 = scalar_lea.vmem [#allocation5], %s295_s25  ;;  %s303_s29 = sshll.u32 %s474_s9, 7 }
  0x3a   : > { %v154_v1 = vmul.f32 %v153_v0, %v153_v0  ;;  %s203_s27 = sshll.u32 %s150_s18, 4  ;;  %s625_s3 = scalar_lea.hbm %s673_s1, %s303_s29  ;;  %s620_s27 = int_to_ptr.vmem [resolvable:$true] %s203_s27 }
  0x3b   : > { %s187_s4 = scalar_lea.sflag [#allocation4], %s607_s24  ;;  %s400_s5 = scalar_lea.vmem %s620_s27, 128 }
  0x3c   : > { %v156_v2 = vcombine.high %v154_v1, %v154_v1  ;;  %v159_v3 = vsel %vm158_vm0, %v154_v1, 0.0  ;;  %p401_p8 = scmp.ne.s32.totalorder %s620_s27, %s400_s5  ;;  %p682_p9 = scmp.ne.s32.totalorder %s677_s19, 0 }
  0x3d   : > { %v160_v4 = vrot.slane %v159_v3, 4  ;;  %s485_s9 = smov [#allocation5]  }
  0x3e   : > { %v166_v5 = vsel %vm158_vm0, %v156_v2, 0.0  ;;  %p402_p11 = pnand %p401_p8, %p682_p9  ;;  %s404_s12 = sshll.u32 %s485_s9, 4  ;;  %s405_s12 = int_to_ptr.vmem [resolvable:$false] %s404_s12 }
  0x3f   : > { %v161_v6 = vadd.f32 %v160_v4, %v159_v3  ;;  %v167_v7 = vrot.slane %v166_v5, 4  ;;  %s406_s13 = scalar_lea.vmem %s405_s12, 256  ;;  %p407_p7 = scmp.lt.s32.totalorder %s620_s27, %s405_s12 }
  0x40   : > { %p403_p0 = pneg %p402_p11  ;;  %p408_p13 = scmp.lt.s32.totalorder %s406_s13, %s400_s5 }
  0x41   : > { %v162_v8 = vrot.slane %v161_v6, 2  ;;  %v168_v9 = vadd.f32 %v167_v7, %v166_v5 }
  0x42   : > { %p409_p3 = por %p408_p13, %p407_p7 }
  0x43   : > { %v163_v10 = vadd.f32 %v162_v8, %v161_v6  ;;  %v169_v11 = vrot.slane %v168_v9, 2 }
  0x44   : > { %p410_p6 = pnand %p409_p3, %p403_p0 }
  0x45   : > { %v164_v12 = vrot.slane %v163_v10, 1  ;;  %v170_v13 = vadd.f32 %v169_v11, %v168_v9 }
  0x47   : > { %v165_v14 = vadd.f32 %v164_v12, %v163_v10  ;;  %v171_v15 = vrot.slane %v170_v13, 1 }
  0x49   : > { %v172_v16 = vadd.f32 %v171_v15, %v170_v13  ;;  %v174_v17 = vmul.f32 0.25, %v165_v14 }
  0x4b   : > { %v175_v18 = vmul.f32 0.25, %v172_v16  ;;  %v176_v19 = vadd.f32 1e-08, %v174_v17 }
  0x4d   : > { %v177_v20 = vadd.f32 1e-08, %v175_v18  ;;  %366 = vrsqrt.f32 %v176_v19 }
  0x4f   : > { %368 = vrsqrt.f32 %v177_v20 }
  0x57   : > { %v367_v21 = vpop.eup %366 }
  0x59   : > { %v369_v22 = vpop.eup %368 }
  0x5a   : > { %v182_v23 = vcombine.low %v367_v21, %v369_v22 }
  0x5c   : > { %v184_v24 = vmul.f32 %v182_v23, %v153_v0 }
  0x5e   : > { %185 = vst [vmem:[%s150_s18] sm:$0xff] %v184_v24 }
  0x5f   : > { %413 = shalt.err (!%p410_p6)
}
  0x60   : > { %s414_s15 = scalar_lea.hbm %s625_s3, 128  ;;  %s418_s22 = scalar_lea.hbm %s673_s1, 256 }
  0x61   : > { %p415_p4 = scmp.ne.s32.totalorder %s625_s3, %s414_s15  ;;  %p419_p1 = scmp.lt.u32.totalorder %s625_s3, %s673_s1 }
  0x62   : > { %p420_p2 = scmp.lt.u32.totalorder %s418_s22, %s414_s15  ;;  %p422_p8 = scmp.lt.u32.totalorder %s414_s15, %s625_s3 }
  0x63   : > { %p416_p10 = pnand %p415_p4, %p682_p9 }
  0x64   : > { %p421_p5 = por %p420_p2, %p419_p1 }
  0x65   : > { %p417_p12 = pneg %p416_p10 }
  0x66   : > { %p423_p11 = por %p422_p8, %p421_p5 }
  0x68   : > { %p424_p0 = pnand %p423_p11, %p417_p12 }
  0x6a   : > { %427 = shalt.err (!%p424_p0)
}
  0x6b   : > { %306 = dma.vmem_to_hbm [thread:$0]  (%p682_p9), %s620_s27, 128, %s625_s3, %s187_s4  }
  0x6c PF: > { %s215_s25 = sand.u32 1, %s462_s6   ;;  %p683_p7 = scmp.ne.s32.totalorder %s678_s21, 0 }
  0x6d   : > { %p684_p13 = scmp.ge.s32.totalorder %s482_s11, 2  ;;  %s216_s26 = scalar_lea.sflag [#allocation4], %s215_s25 }
  0x6f   : > { %p313_p3 = pnand %p684_p13, %p683_p7 }
  0x71   : > { %457 = dma.done.wait (!%p313_p3), %s216_s26, 128  }
  0x72   : > { %459 = vsyncadd (!%p313_p3), %s216_s26, 4294967168  ;;  %s17_s11 = sadd.s32 1, %s482_s11   ;;  %s685_s6 = smov %s466_s7 }
  0x73   : > { %p14_p6 = scmp.ge.s32.totalorder %s17_s11, 4   ;;  %s686_s7 = smov %s470_s8 }
  0x74   : > { %s687_s8 = smov %s552_s20  ;;  %s688_s9 = smov %s478_s10 }
  0x75   : > { %s689_s10 = smov %s691_s14  ;;  %16 = sbr.rel (!%p14_p6) target bundleno = 6 (0x6), region = 69 }
  0x7c   :  { %221 = vsyncpa [#allocation3], 1 }
  0x7d   :  { %223 = vsyncpa [#allocation3 + $0x1], 1 }
  0x7e   :  { %224 = vsyncpa [#allocation4], 1 }
  0x7f   :  { %226 = vsyncpa [#allocation4 + $0x1], 1 }

</bundles_post_ra>
